<compile_context>
chip_gen: v5e
topology: v5e:2x2
jax: 0.10.0
libtpu: 0.0.40
codegen_flags: <defaults>
</compile_context>

<pallas_src>
import functools

import jax
import jax.numpy as jnp
from jax.experimental import pallas as pl
from jax.experimental.pallas import tpu as pltpu


def _pick_channel_tile(c, max_c=64):
    """Channel (sublane) tile: multiple of 8 dividing c, capped, keeping >=4 channel
    blocks for megacore load-balance on large C; else the full channel dim."""
    if c % 8 != 0:
        return c                                  # block == full array dim (allowed)
    cap = min(max_c, c)
    if c >= 32:
        cap = min(cap, max(8, c // 4))            # >= 4 channel blocks when C is large
    cap -= cap % 8
    t = max(cap, 8)
    while c % t != 0:
        t -= 8
    return t


def _pick_lane_tile(hw, c_blk, target_bytes=2 << 20):
    """Lane (last-dim) tile: multiple of 128, sized so c_blk*hw_blk*4 ~= target_bytes."""
    if hw < 128:
        return hw                                 # block == full array dim (allowed)
    cap = max(512, (target_bytes // (4 * c_blk)) // 128 * 128)
    if hw % 128 == 0:
        if hw <= cap:
            return hw
        t = cap                                   # try an evenly-dividing 128-multiple
        while t >= 128:
            if hw % t == 0:
                return t
            t -= 128
        return cap                                # ragged tail handled by the mask
    return min(cap, (hw // 128) * 128)            # lane-dense tile, masked ragged tail


def _bn_stats_kernel(x_ref, sum_ref, sumsq_ref, min_ref, max_ref, *,
                     hw, hw_blk, use_mask):
    """Pass 1: accumulate per-channel sum / sumsq / min / max over the (n, hw) axes."""
    first = jnp.logical_and(pl.program_id(1) == 0, pl.program_id(2) == 0)

    @pl.when(first)
    def _():
        sum_ref[...] = jnp.zeros(sum_ref.shape, jnp.float32)
        sumsq_ref[...] = jnp.zeros(sumsq_ref.shape, jnp.float32)
        min_ref[...] = jnp.full(min_ref.shape, jnp.inf, jnp.float32)
        max_ref[...] = jnp.full(max_ref.shape, -jnp.inf, jnp.float32)

    x = x_ref[...].astype(jnp.float32)                      # (c_blk, hw_blk)
    if use_mask:
        lane = jax.lax.broadcasted_iota(jnp.int32, x.shape, 1)
        valid = (pl.program_id(2) * hw_blk + lane) < hw
        x_sum = jnp.where(valid, x, 0.0)
        x_min = jnp.where(valid, x, jnp.inf)
        x_max = jnp.where(valid, x, -jnp.inf)
    else:
        x_sum = x_min = x_max = x

    # Route sum / sum-of-squares through the MXU (idle otherwise); min/max on VPU/XLU.
    ones = jnp.ones((x.shape[-1], 1), jnp.float32)
    sum_ref[...] += jnp.dot(x_sum, ones, preferred_element_type=jnp.float32)
    sumsq_ref[...] += jnp.dot(x_sum * x_sum, ones, preferred_element_type=jnp.float32)
    min_ref[...] = jnp.minimum(min_ref[...], jnp.min(x_min, axis=-1, keepdims=True))
    max_ref[...] = jnp.maximum(max_ref[...], jnp.max(x_max, axis=-1, keepdims=True))


def _bn_apply_kernel(x_ref, ab_ref, scale_ref, o_ref, *, apply_fake_quant):
    """Pass 2: fused normalize+affine (y = a'*x + b') and optional int8 fake-quant."""
    x = x_ref[...].astype(jnp.float32)                      # (c_blk, hw_blk)
    a = ab_ref[:, 0:1]                                      # (c_blk, 1), lane-broadcast
    b = ab_ref[:, 1:2]
    y = x * a + b                                           # already pre-scaled by 1/scale
    if apply_fake_quant:
        y = jnp.clip(jnp.round(y), -128.0, 127.0) * scale_ref[0]
    o_ref[...] = y.astype(o_ref.dtype)


def batchnorm2d_forward(x, gamma, beta, *, eps=1e-5, fake_quant=True):
    """QAT BatchNorm2d forward.  x: (N, C, H, W) -> (N, C, H, W) float32."""
    n, c, h, w = x.shape
    hw = h * w
    x3 = x.reshape(n, c, hw)                                # free view, no transpose

    c_blk = _pick_channel_tile(c)
    hw_blk = _pick_lane_tile(hw, c_blk)
    hw_steps = pl.cdiv(hw, hw_blk)
    use_mask = (hw % hw_blk) != 0
    grid = (c // c_blk, n, hw_steps)

    x_spec = pl.BlockSpec((None, c_blk, hw_blk), lambda ci, ni, ti: (ni, ci, ti))
    stat_spec = pl.BlockSpec((c_blk, 1), lambda ci, ni, ti: (ci, 0))
    stat_shape = jax.ShapeDtypeStruct((c, 1), jnp.float32)
    x_bytes = n * c * hw * 4

    # ---- Pass 1: per-channel batch statistics (+ min/max for the quant scale) ------
    s, ss, mn, mx = pl.pallas_call(
        functools.partial(_bn_stats_kernel, hw=hw, hw_blk=hw_blk, use_mask=use_mask),
        out_shape=(stat_shape,) * 4,
        grid=grid,
        in_specs=[x_spec],
        out_specs=(stat_spec,) * 4,
        compiler_params=pltpu.CompilerParams(
            dimension_semantics=("parallel", "arbitrary", "arbitrary")),
        cost_estimate=pl.CostEstimate(flops=4 * n * c * hw, transcendentals=0,
                                      bytes_accessed=x_bytes + 16 * c),
    )(x3)

    # ---- Tiny O(C) finalize: fold BN into per-channel a, b; derive quant scale -----
    count = jnp.float32(n * hw)
    mean = s / count                                        # (C, 1)
    # TODO(synk): E[x^2]-E[x]^2 loses precision when |mean| >> std; acceptable in f32
    # for activation-scale inputs, clamped at 0 to avoid negative variance.
    var = jnp.maximum(ss / count - mean * mean, 0.0)        # biased variance
    inv_std = jax.lax.rsqrt(var + jnp.float32(eps))
    a = gamma.reshape(c, 1).astype(jnp.float32) * inv_std
    b = beta.reshape(c, 1).astype(jnp.float32) - mean * a

    if fake_quant:
        # y is affine-monotone in x per channel: extrema of y live at x's extrema.
        y_ends = jnp.maximum(jnp.abs(a * mn + b), jnp.abs(a * mx + b))
        scale = jnp.maximum(jnp.max(y_ends) / 127.0, jnp.float32(1e-12))
        ab = jnp.concatenate([a / scale, b / scale], axis=1)    # (C, 2) pre-scaled
    else:
        scale = jnp.float32(1.0)
        ab = jnp.concatenate([a, b], axis=1)                    # (C, 2)
    scale_arr = jnp.reshape(scale, (1,)).astype(jnp.float32)

    # ---- Pass 2: stream x again, fused normalize + affine + fake-quant -------------
    out3 = pl.pallas_call(
        functools.partial(_bn_apply_kernel, apply_fake_quant=fake_quant),
        out_shape=jax.ShapeDtypeStruct((n, c, hw), jnp.float32),
        grid=grid,
        in_specs=[x_spec,
                  pl.BlockSpec((c_blk, 2), lambda ci, ni, ti: (ci, 0)),
                  pl.BlockSpec(memory_space=pltpu.MemorySpace.SMEM)],
        out_specs=x_spec,
        compiler_params=pltpu.CompilerParams(
            dimension_semantics=("parallel", "parallel", "parallel")),
        cost_estimate=pl.CostEstimate(flops=4 * n * c * hw, transcendentals=0,
                                      bytes_accessed=2 * x_bytes + 8 * c),
    )(x3, ab, scale_arr)

    return out3.reshape(n, c, h, w)


def _reference(x, gamma, beta, *, eps=1e-5, fake_quant=True):
    """Pure-JAX reference matching PyTorch BatchNorm2d (training) + fake-quant."""
    mean = jnp.mean(x, axis=(0, 2, 3), keepdims=True)
    var = jnp.mean((x - mean) ** 2, axis=(0, 2, 3), keepdims=True)
    y = (x - mean) * jax.lax.rsqrt(var + eps)
    y = y * gamma.reshape(1, -1, 1, 1) + beta.reshape(1, -1, 1, 1)
    scale = jnp.maximum(jnp.max(jnp.abs(y)) / 127.0, 1e-12)
    if fake_quant:
        y = jnp.clip(jnp.round(y / scale), -128.0, 127.0) * scale
    return y, scale


if __name__ == "__main__":
    key = jax.random.PRNGKey(0)

    def check(shape, tag):
        n, c, h, w = shape
        kx = jax.random.fold_in(key, h * w + c)
        x = jax.random.normal(kx, (n, c, h, w), dtype=jnp.float32) * 2.0 + 0.5
        # Deterministic non-trivial affine params (torch default init is ones/zeros).
        gamma = 1.0 + 0.1 * jnp.arange(c, dtype=jnp.float32)
        beta = 0.05 * jnp.arange(c, dtype=jnp.float32)

        # 1) Strict check of the streamed BatchNorm math (no fake-quant).
        out_f = jax.block_until_ready(
            batchnorm2d_forward(x, gamma, beta, eps=1e-5, fake_quant=False))
        ref_f, _ = _reference(x, gamma, beta, eps=1e-5, fake_quant=False)
        assert out_f.shape == (n, c, h, w) and out_f.dtype == jnp.float32
        assert jnp.allclose(out_f, ref_f, rtol=1e-4, atol=1e-4), f"BN mismatch ({tag})"

        # 2) Fake-quant path: float reassociation between the streamed two-pass kernel
        #    and the monolithic reference may move isolated elements by one quant LSB.
        out_q = jax.block_until_ready(
            batchnorm2d_forward(x, gamma, beta, eps=1e-5, fake_quant=True))
        ref_q, ref_scale = _reference(x, gamma, beta, eps=1e-5, fake_quant=True)
        assert out_q.shape == (n, c, h, w) and out_q.dtype == jnp.float32
        diff = jnp.abs(out_q - ref_q)
        assert bool(jnp.all(diff <= ref_scale * 1.001 + 1e-5)), \
            f"fake-quant mismatch > 1 LSB ({tag})"
        assert float(jnp.mean((diff > 1e-4).astype(jnp.float32))) < 0.01, \
            f"too many fake-quant LSB flips ({tag})"

    check((2, 4, 16, 16), "dense-lane")    # HW multiple of 128: unmasked path
    check((2, 4, 14, 14), "ragged-lane")   # HW = 196: masked ragged-tail path
    print("KERNEL_OK")
</pallas_src>

<mosaic_0001>
module attributes {stable_mosaic.version = 11 : i64} {
  func.func @_bn_stats_kernel(%arg0: i32, %arg1: i32, %arg2: i32, %arg3: memref<1x4x256xf32, #tpu.memory_space<vmem>>, %arg4: memref<4x1xf32, #tpu.memory_space<vmem>>, %arg5: memref<4x1xf32, #tpu.memory_space<vmem>>, %arg6: memref<4x1xf32, #tpu.memory_space<vmem>>, %arg7: memref<4x1xf32, #tpu.memory_space<vmem>>) attributes {dimension_semantics = [#tpu.dimension_semantics<parallel>, #tpu.dimension_semantics<arbitrary>, #tpu.dimension_semantics<arbitrary>], iteration_bounds = array<i64: 1, 2, 1>, scalar_prefetch = 0 : i64, scratch_operands = 0 : i64, tpu.core_type = #tpu.core_type<tc>, window_params = [{transform_indices = @transform_0, window_bounds = array<i64: 1, 4, 256>}, {transform_indices = @transform_1, window_bounds = array<i64: 4, 1>}, {transform_indices = @transform_2, window_bounds = array<i64: 4, 1>}, {transform_indices = @transform_3, window_bounds = array<i64: 4, 1>}, {transform_indices = @transform_4, window_bounds = array<i64: 4, 1>}]} {
    %c0_i32 = arith.constant 0 : i32
    %0 = arith.cmpi eq, %arg1, %c0_i32 : i32
    %c0_i32_0 = arith.constant 0 : i32
    %1 = arith.cmpi eq, %arg2, %c0_i32_0 : i32
    %2 = arith.andi %0, %1 : i1
    %3 = arith.extui %2 : i1 to i32
    %c0_i32_1 = arith.constant 0 : i32
    %4 = arith.cmpi ne, %3, %c0_i32_1 : i32
    scf.if %4 {
      %cst_24 = arith.constant 0.000000e+00 : f32
      %27 = vector.broadcast %cst_24 : f32 to vector<4x1xf32>
      %c0_25 = arith.constant 0 : index
      %c0_26 = arith.constant 0 : index
      %28 = vector.load %arg4[%c0_25, %c0_26] : memref<4x1xf32, #tpu.memory_space<vmem>>, vector<4x1xf32>
      tpu.vector_store %arg4[%c0_25, %c0_26], %27 {strides = array<i32>} : memref<4x1xf32, #tpu.memory_space<vmem>>, vector<4x1xf32>,
      %cst_27 = arith.constant 0.000000e+00 : f32
      %29 = vector.broadcast %cst_27 : f32 to vector<4x1xf32>
      %c0_28 = arith.constant 0 : index
      %c0_29 = arith.constant 0 : index
      %30 = vector.load %arg5[%c0_28, %c0_29] : memref<4x1xf32, #tpu.memory_space<vmem>>, vector<4x1xf32>
      tpu.vector_store %arg5[%c0_28, %c0_29], %29 {strides = array<i32>} : memref<4x1xf32, #tpu.memory_space<vmem>>, vector<4x1xf32>,
      %cst_30 = arith.constant 0x7F800000 : f32
      %31 = vector.broadcast %cst_30 : f32 to vector<4x1xf32>
      %c0_31 = arith.constant 0 : index
      %c0_32 = arith.constant 0 : index
      %32 = vector.load %arg6[%c0_31, %c0_32] : memref<4x1xf32, #tpu.memory_space<vmem>>, vector<4x1xf32>
      tpu.vector_store %arg6[%c0_31, %c0_32], %31 {strides = array<i32>} : memref<4x1xf32, #tpu.memory_space<vmem>>, vector<4x1xf32>,
      %cst_33 = arith.constant 0xFF800000 : f32
      %33 = vector.broadcast %cst_33 : f32 to vector<4x1xf32>
      %c0_34 = arith.constant 0 : index
      %c0_35 = arith.constant 0 : index
      %34 = vector.load %arg7[%c0_34, %c0_35] : memref<4x1xf32, #tpu.memory_space<vmem>>, vector<4x1xf32>
      tpu.vector_store %arg7[%c0_34, %c0_35], %33 {strides = array<i32>} : memref<4x1xf32, #tpu.memory_space<vmem>>, vector<4x1xf32>,
    } else {
    }
    %c0 = arith.constant 0 : index
    %c0_2 = arith.constant 0 : index
    %c0_3 = arith.constant 0 : index
    %5 = vector.load %arg3[%c0, %c0_2, %c0_3] : memref<1x4x256xf32, #tpu.memory_space<vmem>>, vector<1x4x256xf32>
    %6 = vector.shape_cast %5 : vector<1x4x256xf32> to vector<4x256xf32>
    %cst = arith.constant 1.000000e+00 : f32
    %7 = vector.broadcast %cst : f32 to vector<256x1xf32>
    %c0_4 = arith.constant 0 : index
    %c0_5 = arith.constant 0 : index
    %8 = vector.load %arg4[%c0_4, %c0_5] : memref<4x1xf32, #tpu.memory_space<vmem>>, vector<4x1xf32>
    %cst_6 = arith.constant dense<0.000000e+00> : vector<4x1xf32>
    %9 = tpu.matmul %6, %7, %cst_6 {dimension_numbers = #tpu.dot_dimension_numbers<[1], [0], [0], [1], [0, 0, 1, 1], [], []>} : vector<4x256xf32>, vector<256x1xf32>, vector<4x1xf32> -> vector<4x1xf32>
    %10 = arith.addf %8, %9 : vector<4x1xf32>
    %c0_7 = arith.constant 0 : index
    %c0_8 = arith.constant 0 : index
    %11 = vector.load %arg4[%c0_7, %c0_8] : memref<4x1xf32, #tpu.memory_space<vmem>>, vector<4x1xf32>
    tpu.vector_store %arg4[%c0_7, %c0_8], %10 {strides = array<i32>} : memref<4x1xf32, #tpu.memory_space<vmem>>, vector<4x1xf32>,
    %c0_9 = arith.constant 0 : index
    %c0_10 = arith.constant 0 : index
    %12 = vector.load %arg5[%c0_9, %c0_10] : memref<4x1xf32, #tpu.memory_space<vmem>>, vector<4x1xf32>
    %13 = arith.mulf %6, %6 : vector<4x256xf32>
    %cst_11 = arith.constant dense<0.000000e+00> : vector<4x1xf32>
    %14 = tpu.matmul %13, %7, %cst_11 {dimension_numbers = #tpu.dot_dimension_numbers<[1], [0], [0], [1], [0, 0, 1, 1], [], []>} : vector<4x256xf32>, vector<256x1xf32>, vector<4x1xf32> -> vector<4x1xf32>
    %15 = arith.addf %12, %14 : vector<4x1xf32>
    %c0_12 = arith.constant 0 : index
    %c0_13 = arith.constant 0 : index
    %16 = vector.load %arg5[%c0_12, %c0_13] : memref<4x1xf32, #tpu.memory_space<vmem>>, vector<4x1xf32>
    tpu.vector_store %arg5[%c0_12, %c0_13], %15 {strides = array<i32>} : memref<4x1xf32, #tpu.memory_space<vmem>>, vector<4x1xf32>,
    %c0_14 = arith.constant 0 : index
    %c0_15 = arith.constant 0 : index
    %17 = vector.load %arg6[%c0_14, %c0_15] : memref<4x1xf32, #tpu.memory_space<vmem>>, vector<4x1xf32>
    %cst_16 = arith.constant dense<0x7F800000> : vector<4xf32>
    %18 = vector.multi_reduction <minimumf>, %6, %cst_16 [1] : vector<4x256xf32> to vector<4xf32>
    %19 = vector.shape_cast %18 : vector<4xf32> to vector<4x1xf32>
    %20 = arith.minimumf %17, %19 : vector<4x1xf32>
    %c0_17 = arith.constant 0 : index
    %c0_18 = arith.constant 0 : index
    %21 = vector.load %arg6[%c0_17, %c0_18] : memref<4x1xf32, #tpu.memory_space<vmem>>, vector<4x1xf32>
    tpu.vector_store %arg6[%c0_17, %c0_18], %20 {strides = array<i32>} : memref<4x1xf32, #tpu.memory_space<vmem>>, vector<4x1xf32>,
    %c0_19 = arith.constant 0 : index
    %c0_20 = arith.constant 0 : index
    %22 = vector.load %arg7[%c0_19, %c0_20] : memref<4x1xf32, #tpu.memory_space<vmem>>, vector<4x1xf32>
    %cst_21 = arith.constant dense<0xFF800000> : vector<4xf32>
    %23 = vector.multi_reduction <maximumf>, %6, %cst_21 [1] : vector<4x256xf32> to vector<4xf32>
    %24 = vector.shape_cast %23 : vector<4xf32> to vector<4x1xf32>
    %25 = arith.maximumf %22, %24 : vector<4x1xf32>
    %c0_22 = arith.constant 0 : index
    %c0_23 = arith.constant 0 : index
    %26 = vector.load %arg7[%c0_22, %c0_23] : memref<4x1xf32, #tpu.memory_space<vmem>>, vector<4x1xf32>
    tpu.vector_store %arg7[%c0_22, %c0_23], %25 {strides = array<i32>} : memref<4x1xf32, #tpu.memory_space<vmem>>, vector<4x1xf32>,
    return
  }
  func.func @transform_0(%arg0: i32, %arg1: i32, %arg2: i32) -> (i32, i32, i32) {
    %c0_i32 = arith.constant 0 : i32
    return %arg1, %arg0, %arg2 : i32, i32, i32
  }
  func.func @transform_1(%arg0: i32, %arg1: i32, %arg2: i32) -> (i32, i32) {
    %c0_i32 = arith.constant 0 : i32
    %c0_i32_0 = arith.constant 0 : i32
    return %arg0, %c0_i32 : i32, i32
  }
  func.func @transform_2(%arg0: i32, %arg1: i32, %arg2: i32) -> (i32, i32) {
    %c0_i32 = arith.constant 0 : i32
    %c0_i32_0 = arith.constant 0 : i32
    return %arg0, %c0_i32 : i32, i32
  }
  func.func @transform_3(%arg0: i32, %arg1: i32, %arg2: i32) -> (i32, i32) {
    %c0_i32 = arith.constant 0 : i32
    %c0_i32_0 = arith.constant 0 : i32
    return %arg0, %c0_i32 : i32, i32
  }
  func.func @transform_4(%arg0: i32, %arg1: i32, %arg2: i32) -> (i32, i32) {
    %c0_i32 = arith.constant 0 : i32
    %c0_i32_0 = arith.constant 0 : i32
    return %arg0, %c0_i32 : i32, i32
  }
}

</mosaic_0001>

<bundles_post_ra>
// kernel: tpu_custom_call.1
= control target key start
LH: loop header
LB: loop body
LE: loop exit
PB: predicated region body
PF: predicated region fallthrough
CT: control target
= control target key end

     0   :  { %10 = vsyncpa [#allocation3], 0  ;;  %s961_s0 = inlined_call_operand.hbm [shape: f32[2,4,256], index: 0, kind: input, shape index: {}]   ;;  %s962_s1 = inlined_call_operand.vmem [shape: f32[4,1], index: 1, kind: output, shape index: {0}]   ;;  %s963_s2 = inlined_call_operand.vmem [shape: f32[4,1], index: 2, kind: output, shape index: {1}]   ;;  %s964_s3 = inlined_call_operand.vmem [shape: f32[4,1], index: 3, kind: output, shape index: {2}]   ;;  %s965_s4 = inlined_call_operand.vmem [shape: f32[4,1], index: 4, kind: output, shape index: {3}]  }
   0x1   :  { %12 = vsyncpa [#allocation3 + $0x1], 0  ;;  %s763_s15 = smov 0   ;;  %s765_s16 = smov 0  }
   0x2   :  { %s767_s17 = smov 0   ;;  %s769_s18 = smov 0  }
   0x3   :  { %s771_s19 = smov 0   ;;  %s773_s20 = smov 0  }
   0x4 LB: > { %s576_s21 = sadd.s32 4294967295, %s732_s20   ;;  %s33_s22 = sadd.s32 1, %s728_s19  ;;  %s732_s20 = sphi %s773_s20, %s18_s20   ;;  %s728_s19 = sphi %s771_s19, %s972_s19   ;;  %s724_s18 = sphi %s769_s18, %s971_s18   ;;  %s720_s17 = sphi %s767_s17, %s970_s17   ;;  %s716_s16 = sphi %s765_s16, %s969_s16   ;;  %s712_s15 = sphi %s763_s15, %s968_s15  }
   0x5   : > { %p35_p0 = scmp.ge.s32.totalorder %s33_s22, 2  ;;  %s48_s23 = sadd.s32 1, %s720_s17 }
   0x6   : > { %p55_p1 = scmp.ne.s32.totalorder %s720_s17, %s716_s16  ;;  %p56_p2 = scmp.eq.s32.totalorder %s732_s20, 0 }
   0x7   : > { %s974_s22 = smov (%p35_p0, %s33_s22), 0  ;;  %p61_p4 = scmp.ne.s32.totalorder %s716_s16, %s712_s15 }
   0x8   : > { %p799_p3 = por %p56_p2, %p55_p1  ;;  %s41_s25 = ssub.s32 %s728_s19, %s974_s22 }
   0x9   : > { %p62_p5 = scmp.eq.s32.totalorder %s576_s21, 0  ;;  %p46_p6 = scmp.eq.s32.totalorder %s41_s25, 0 }
   0xa   : > { %p599_p8 = scmp.lt.s32.totalorder %s732_s20, 2  ;;  %s189_s28 = sand.u32 1, %s720_s17  }
   0xb   : > { %p806_p7 = por %p62_p5, %p61_p4  ;;  %s591_s29 = sshll.u32 %s728_s19, 3 }
   0xc   : > { %s812_s27 = scalar_select %p46_p6, %s720_s17, %s48_s23  }
   0xd   : > { %s579_s30 = sshll.u32 %s189_s28, 3  ;;  %s202_s7 = scalar_lea.hbm %s961_s0, %s591_s29 }
   0xe   : > { %s204_s8 = sshll.u32 %s202_s7, 4  ;;  %s193_s9 = scalar_lea.vmem [#allocation2], %s579_s30  ;;  %s205_s8 = int_to_ptr.hbm [resolvable:$true] %s204_s8 }
   0xf   : > { %s206_s10 = sshll.u32 %s193_s9, 4  ;;  %p596_p9 = pnand %p599_p8, %p799_p3  ;;  %s207_s10 = int_to_ptr.vmem [resolvable:$true] %s206_s10 }
  0x10   : > { %p582_p10 = scmp.ge.s32.totalorder %s732_s20, 1  ;;  %p211_p11 = scmp.lt.s32.totalorder %s732_s20, 3 }
  0x11   : > { %s190_s11 = scalar_lea.sflag [#allocation3], %s189_s28 }
  0x12   : > { %598 = dma.hbm_to_vmem [thread:$0]  (!%p596_p9), %s205_s8, 128, %s207_s10, %s190_s11  }
  0x13   : > { %p212_p12 = pnand %p582_p10, %p211_p11 }
  0x14   : > { %s217_s12 = sand.u32 (!%p212_p12), 1, %s716_s16  }
  0x15   : > { %215 = sbr.rel (%p212_p12) target bundleno = 203 (0xcb), region = 24  ;;  %s583_s13 = sshll.u32 (!%p212_p12), %s217_s12, 3 }
  0x16   : > { %s218_s14 = scalar_lea.sflag (!%p212_p12), [#allocation3], %s217_s12  ;;  %s221_s15 = scalar_lea.vmem (!%p212_p12), [#allocation2], %s583_s13 }
  0x1a   : > { %707 = dma.done.wait (%p806_p7), %s218_s14, 128  }
  0x1b   : > { %709 = vsyncadd (%p806_p7), %s218_s14, 4294967168  ;;  %p275_p13 = scmp.eq.s32.totalorder %s724_s18, 0 }
  0x1c   : > { %vm281_vm0 = vcmask (%p275_p13), 3072   ;;  %v734_v0 = vmov (%p275_p13), 0.0   ;;  %v735_v1 = vmov (%p275_p13), inf   ;;  %v736_v2 = vmov (%p275_p13), -inf  }
  0x1d   : > { %280 = sbr.rel (!%p275_p13) target bundleno = 34 (0x22), region = 32  ;;  %282 = vst.msk [vmem:[%s962_s1] sm:$0xf] (%p275_p13), %vm281_vm0, %v734_v0 }
  0x1e   : > { %283 = vst.msk [vmem:[%s963_s2] sm:$0xf] (%p275_p13), %vm281_vm0, %v734_v0 }
  0x1f   : > { %284 = vst.msk [vmem:[%s964_s3] sm:$0xf] (%p275_p13), %vm281_vm0, %v735_v1 }
  0x20   : > { %285 = vst.msk [vmem:[%s965_s4] sm:$0xf] (%p275_p13), %vm281_vm0, %v736_v2 }
  0x22 PF: > { %v286_v3 = vld [vmem:[%s221_s15] sm:$0xff]  ;;  %v737_v4 = vmov 1.0   ;;  %vm393_vm1 = vcmask 1043456   ;;  %vm335_vm2 = vcmask 3072  }
  0x23   : > { %345 = vmatpush.msra.mxu2 %v737_v4  ;;  %365 = vmatpush.msra.mxu3 %v737_v4  ;;  %289 = vst [vmem:[#allocation1] ss:$2 sm:$0xff] %v286_v3  ;;  %v338_v5 = vmul.f32 %v286_v3, %v286_v3 }
  0x24   : > { %294 = vmatpush.msra.mxu0 %v737_v4  ;;  %314 = vmatpush.msra.mxu1 %v737_v4  ;;  %v287_v26 = vld [vmem:[%s962_s1] sm:$0xf] }
  0x25   : > { %346 = vmatpush.msra.mxu2 %v737_v4  ;;  %366 = vmatpush.msra.mxu3 %v737_v4  ;;  %v337_v32 = vld [vmem:[%s963_s2] sm:$0xf] }
  0x26   : > { %295 = vmatpush.msra.mxu0 %v737_v4  ;;  %315 = vmatpush.msra.mxu1 %v737_v4  ;;  %v387_v20 = vld [vmem:[%s964_s3] sm:$0xf] }
  0x27   : > { %347 = vmatpush.msra.mxu2 %v737_v4  ;;  %367 = vmatpush.msra.mxu3 %v737_v4  ;;  %v401_v23 = vld [vmem:[%s965_s4] sm:$0xf] }
  0x28   : > { %296 = vmatpush.msra.mxu0 %v737_v4  ;;  %316 = vmatpush.msra.mxu1 %v737_v4 }
  0x29   : > { %348 = vmatpush.msra.mxu2 %v737_v4  ;;  %368 = vmatpush.msra.mxu3 %v737_v4 }
  0x2a   : > { %297 = vmatpush.msra.mxu0 %v737_v4  ;;  %317 = vmatpush.msra.mxu1 %v737_v4  ;;  %v857_v6 = vld.sshfl [vmem:[#allocation1] sm:$0xff pattern:$0x75316420]  ;;  %v859_v7 = vld.sshfl [vmem:[#allocation1 + $0x8] sm:$0xff pattern:$0x75316420] }
  0x2b   : > { %349 = vmatpush.msra.mxu2 %v737_v4  ;;  %369 = vmatpush.msra.mxu3 %v737_v4  ;;  %340 = vst [vmem:[#allocation1] ss:$2 sm:$0xff] %v338_v5 }
  0x2c   : > { %298 = vmatpush.msra.mxu0 %v737_v4  ;;  %318 = vmatpush.msra.mxu1 %v737_v4 }
  0x2d   : > { %350 = vmatpush.msra.mxu2 %v737_v4  ;;  %370 = vmatpush.msra.mxu3 %v737_v4 }
  0x2e   : > { %299 = vmatpush.msra.mxu0 %v737_v4  ;;  %319 = vmatpush.msra.mxu1 %v737_v4 }
  0x2f   : > { %351 = vmatpush.msra.mxu2 %v737_v4  ;;  %371 = vmatpush.msra.mxu3 %v737_v4 }
  0x30   : > { %300 = vmatpush.msra.mxu0 %v737_v4  ;;  %320 = vmatpush.msra.mxu1 %v737_v4 }
  0x31   : > { %352 = vmatpush.msra.mxu2 %v737_v4  ;;  %372 = vmatpush.msra.mxu3 %v737_v4 }
  0x32   : > { %301 = vmatpush.msra.mxu0 %v737_v4  ;;  %321 = vmatpush.msra.mxu1 %v737_v4  ;;  %v341_v8 = vld.sshfl [vmem:[#allocation1] sm:$0xff pattern:$0x75316420]  ;;  %v342_v9 = vld.sshfl [vmem:[#allocation1 + $0x8] sm:$0xff pattern:$0x75316420] }
  0x33   : > { %353 = vmatpush.msra.mxu2 %v737_v4  ;;  %373 = vmatpush.msra.mxu3 %v737_v4  ;;  %388 = vst [vmem:[#allocation1] ss:$2 sm:$0xff] %v286_v3 }
  0x34   : > { %302 = vmatpush.msra.mxu0 %v737_v4  ;;  %322 = vmatpush.msra.mxu1 %v737_v4 }
  0x35   : > { %354 = vmatpush.msra.mxu2 %v737_v4  ;;  %374 = vmatpush.msra.mxu3 %v737_v4 }
  0x36   : > { %303 = vmatpush.msra.mxu0 %v737_v4  ;;  %323 = vmatpush.msra.mxu1 %v737_v4 }
  0x37   : > { %355 = vmatpush.msra.mxu2 %v737_v4  ;;  %375 = vmatpush.msra.mxu3 %v737_v4 }
  0x38   : > { %304 = vmatpush.msra.mxu0 %v737_v4  ;;  %324 = vmatpush.msra.mxu1 %v737_v4 }
  0x39   : > { %356 = vmatpush.msra.mxu2 %v737_v4  ;;  %376 = vmatpush.msra.mxu3 %v737_v4 }
  0x3a   : > { %305 = vmatpush.msra.mxu0 %v737_v4  ;;  %325 = vmatpush.msra.mxu1 %v737_v4  ;;  %v389_v10 = vld.sshfl [vmem:[#allocation1] sm:$0xff pattern:$0x75316420]  ;;  %v390_v11 = vld.sshfl [vmem:[#allocation1 + $0x8] sm:$0xff pattern:$0x75316420] }
  0x3b   : > { %357 = vmatpush.msra.mxu2 %v737_v4  ;;  %377 = vmatpush.msra.mxu3 %v737_v4  ;;  %402 = vst [vmem:[#allocation1] ss:$2 sm:$0xff] %v286_v3  ;;  %v394_v12 = vsel %vm393_vm1, %v389_v10, inf  ;;  %v395_v13 = vsel %vm393_vm1, %v390_v11, inf }
  0x3c   : > { %306 = vmatpush.msra.mxu0 %v737_v4  ;;  %326 = vmatpush.msra.mxu1 %v737_v4  ;;  %v396_v14 = vmin.f32 %v394_v12, %v395_v13 }
  0x3d   : > { %358 = vmatpush.msra.mxu2 %v737_v4  ;;  %378 = vmatpush.msra.mxu3 %v737_v4 }
  0x3e   : > { %307 = vmatpush.msra.mxu0 %v737_v4  ;;  %327 = vmatpush.msra.mxu1 %v737_v4 }
  0x3f   : > { %359 = vmatpush.msra.mxu2 %v737_v4  ;;  %379 = vmatpush.msra.mxu3 %v737_v4 }
  0x40   : > { %308 = vmatpush.msra.mxu0 %v737_v4  ;;  %328 = vmatpush.msra.mxu1 %v737_v4 }
  0x41   : > { %360 = vmatpush.msra.mxu2 %v737_v4  ;;  %380 = vmatpush.msra.mxu3 %v737_v4 }
  0x42   : > { %361 = vmatmul.f32.vlgmr.msra.gmra.mxu2 %v341_v8  ;;  %381 = vmatmul.f32.vlgmr.msra.gmra.mxu3 %v342_v9  ;;  %v403_v15 = vld.sshfl [vmem:[#allocation1] sm:$0xff pattern:$0x75316420]  ;;  %v404_v16 = vld.sshfl [vmem:[#allocation1 + $0x8] sm:$0xff pattern:$0x75316420] }
  0x43   : > { %309 = vmatpush.msra.mxu0 %v737_v4  ;;  %329 = vmatpush.msra.mxu1 %v737_v4  ;;  %v407_v17 = vsel %vm393_vm1, %v403_v15, -inf  ;;  %v408_v18 = vsel %vm393_vm1, %v404_v16, -inf }
  0x44   : > { %310 = vmatmul.f32.vlgmr.msra.gmra.mxu0 %v857_v6  ;;  %330 = vmatmul.f32.vlgmr.msra.gmra.mxu1 %v859_v7  ;;  %v409_v19 = vmax.f32 %v407_v17, %v408_v18 }
  0x45   : > { %397 = vmin.xlane.f32.xlu0 %v396_v14 }
  0x4d   : > { %410 = vmax.xlane.f32.xlu0 %v409_v19 }
  0xb8   : > { %v398_v21 = vpop.xlane.xlu0 %397 }
  0xb9   : > { %v399_v22 = vmin.f32 %v387_v20, %v398_v21 }
  0xbb   : > { %400 = vst.msk [vmem:[%s964_s3] sm:$0xf] %vm335_vm2, %v399_v22 }
  0xc0   : > { %v411_v24 = vpop.xlane.xlu0 %410 }
  0xc1   : > { %v311_v25 = vpop.f32.mrf.mxu0  ;;  %v331_v27 = vpop.f32.mrf.mxu1  ;;  %v412_v28 = vmax.f32 %v401_v23, %v411_v24 }
  0xc2   : > { %v332_v29 = vadd.f32 %v331_v27, %v311_v25 }
  0xc3   : > { %413 = vst.msk [vmem:[%s965_s4] sm:$0xf] %vm335_vm2, %v412_v28 }
  0xc4   : > { %v334_v30 = vadd.f32 %v332_v29, %v287_v26 }
  0xc5   : > { %v362_v31 = vpop.f32.mrf.mxu2  ;;  %v382_v33 = vpop.f32.mrf.mxu3 }
  0xc6   : > { %336 = vst.msk [vmem:[%s962_s1] sm:$0xf] %vm335_vm2, %v334_v30  ;;  %v383_v34 = vadd.f32 %v382_v33, %v362_v31 }
  0xc8   : > { %v385_v35 = vadd.f32 %v383_v34, %v337_v32 }
  0xca   : > { %386 = vst.msk [vmem:[%s963_s2] sm:$0xf] %vm335_vm2, %v385_v35 }
  0xcb PF: > { %s18_s20 = sadd.s32 1, %s732_s20   ;;  %s968_s15 = smov %s716_s16 }
  0xcc   : > { %p15_p0 = scmp.ge.s32.totalorder %s18_s20, 4   ;;  %s969_s16 = smov %s720_s17 }
  0xcd   : > { %s970_s17 = smov %s812_s27  ;;  %s971_s18 = smov %s728_s19 }
  0xce   : > { %s972_s19 = smov %s974_s22  ;;  %17 = sbr.rel (!%p15_p0) target bundleno = 4 (0x4), region = 104 }
  0xd3   :  { %475 = vsyncpa [#allocation3], 1 }
  0xd4   :  { %477 = vsyncpa [#allocation3 + $0x1], 1 }

</bundles_post_ra>
